<compile_context>
chip_gen: v7x
topology: tpu7x:2x2x1
jax: 0.10.0
libtpu: 0.0.40
codegen_flags: <defaults>
</compile_context>

<pallas_src>
import functools

import jax
import jax.numpy as jnp
from jax.experimental import pallas as pl
from jax.experimental.pallas import tpu as pltpu

MAX_LENGTH = 77                # module default max_length
SEQ_PAD = 128                  # lane-dense compute width (multiple of 128)
MAX_CONTENT = MAX_LENGTH - 2   # room for [CLS] and [SEP]
CLS_ID = 101                   # bert-base-uncased [CLS]
SEP_ID = 102                   # bert-base-uncased [SEP]
PAD_ID = 0                     # bert-base-uncased [PAD]
UNUSED_LOW = 999               # ids < 999 are special/unused in bert-base-uncased
_JNP_PATH_MAX_BATCH = 2048     # below this, a fused jnp expression beats pallas_call


def _round_up(x, m):
    return (x + m - 1) // m * m


def _cdiv(a, b):
    return -(-a // b)


def _hash_codes_u32(codes_u32):
    """uint32 LCG + xorshift hash into [0, 2^14); shared by kernel and jnp paths."""
    h = codes_u32 * jnp.uint32(1103515245) + jnp.uint32(12345)
    h = h ^ jax.lax.shift_right_logical(h, jnp.uint32(16))
    return h & jnp.uint32(0x3FFF)


def bert_tokenize_kernel(n_ref, codes_ref, out_ref, wide_ref, *, w_keep):
    """n_ref:     (TB, 1)   int32 word count per row, pre-clipped to [0, w_keep]
       codes_ref: (TB, W)   int32 per-word integer codes
       out_ref:   (TB, 128) int32 token ids (lane-dense; consumer may trim to 77)
       wide_ref:  (TB, 128) int32 VMEM scratch used to lane-widen the content."""
    tb = out_ref.shape[0]
    n = n_ref[...]                                               # (TB, 1)
    pos = jax.lax.broadcasted_iota(jnp.int32, (tb, SEQ_PAD), 1)  # (TB, 128)
    d = pos - n                                                  # n broadcast once

    # Deterministic "wordpiece lookup" over only the w_keep real code lanes.
    # TODO(synk): real WordPiece subword/string matching has no Pallas equivalent.
    codes = codes_ref[:, :w_keep]
    h = _hash_codes_u32(pltpu.bitcast(codes, jnp.uint32))
    content_w = jnp.int32(UNUSED_LOW) + pltpu.bitcast(h, jnp.int32)   # (TB, w_keep)

    # Lane-widen w_keep -> 128 via an aligned masked store into scratch, then
    # shift one lane right with an XLU roll so word j lands at token slot j+1.
    # Scratch lanes >= w_keep are never needed: content128 values only survive
    # the selects for 1 <= pos <= n <= w_keep (lane 0 becomes [CLS], lanes > n
    # become [SEP]/[PAD]), so the scratch needs no zero-fill.
    wide_ref[:, :w_keep] = content_w
    content128 = pltpu.roll(wide_ref[...], shift=1, axis=1)

    tok = jnp.where(d <= 0, content128, jnp.int32(PAD_ID))
    tok = jnp.where(pos == 0, jnp.int32(CLS_ID), tok)
    tok = jnp.where(d == 1, jnp.int32(SEP_ID), tok)
    out_ref[...] = tok


def _tokenize_jnp(word_codes, n, out_width):
    """Fused jnp reference / small-batch path (XLA fuses it into the consumer)."""
    _, W = word_codes.shape
    w_keep = min(W, MAX_CONTENT)
    codes = word_codes[:, :w_keep].astype(jnp.int32)
    h = _hash_codes_u32(jax.lax.bitcast_convert_type(codes, jnp.uint32))
    content = jnp.int32(UNUSED_LOW) + h.astype(jnp.int32)
    content_shift = jnp.pad(content, ((0, 0), (1, out_width - 1 - w_keep)))
    pos = jnp.arange(out_width, dtype=jnp.int32)[None, :]
    d = pos - n
    tok = jnp.where(d <= 0, content_shift, jnp.int32(PAD_ID))
    tok = jnp.where(pos == 0, jnp.int32(CLS_ID), tok)
    tok = jnp.where(d == 1, jnp.int32(SEP_ID), tok)
    return tok


def bert_tokenizer_forward(word_codes, lengths, *, tile_b_max=4096,
                           use_kernel=None, trim_output=True):
    """word_codes: (B, W) int per-word integer codes (host glue from text)
       lengths:    (B,)   int number of words per example
       returns:    (B, 77) int32 token ids; with trim_output=False returns the
                   lane-dense (B, 128) slab (lanes 77..127 are PAD) so a fusing
                   consumer can skip the separate trim pass."""
    B, W = word_codes.shape
    w_keep = min(W, MAX_CONTENT)
    word_codes = word_codes.astype(jnp.int32)
    # Single clip (wrapper only): to the codes actually available AND the
    # max_length-2 content budget.
    n = jnp.clip(lengths.astype(jnp.int32), 0, w_keep).reshape(B, 1)

    out_width = MAX_LENGTH if trim_output else SEQ_PAD
    if use_kernel is None:
        use_kernel = B >= _JNP_PATH_MAX_BATCH
    if not use_kernel:
        # Launch-overhead-bound regime: one fused elementwise expression.
        return _tokenize_jnp(word_codes, n, out_width)

    # --- batch tiling --------------------------------------------------------
    # Balanced tiles (waste < 8 rows per tile), >= 2 grid steps once there is
    # enough work so both v7x TensorCores share the "parallel" axis, and
    # tile_b_max=4096 (out buffer ~2 MiB) stays well inside every generation's
    # scoped-VMEM budget (raised to 32 MiB for headroom, incl. v5e).
    b8 = _round_up(B, 8)
    num_tiles = max(_cdiv(b8, tile_b_max), 1)
    if b8 >= 16:
        num_tiles = max(num_tiles, 2)
    tile_b = _round_up(_cdiv(b8, num_tiles), 8)
    num_tiles = _cdiv(b8, tile_b)
    b_final = num_tiles * tile_b

    if b_final != B:
        pad = b_final - B
        word_codes = jnp.pad(word_codes, ((0, pad), (0, 0)))
        n = jnp.pad(n, ((0, pad), (0, 0)))

    kernel = functools.partial(bert_tokenize_kernel, w_keep=w_keep)
    tokens128 = pl.pallas_call(
        kernel,
        out_shape=jax.ShapeDtypeStruct((b_final, SEQ_PAD), jnp.int32),
        grid=(num_tiles,),
        in_specs=[pl.BlockSpec((tile_b, 1), lambda i: (i, 0)),     # clipped lengths
                  pl.BlockSpec((tile_b, W), lambda i: (i, 0))],    # word codes
        out_specs=pl.BlockSpec((tile_b, SEQ_PAD), lambda i: (i, 0)),
        scratch_shapes=[pltpu.VMEM((tile_b, SEQ_PAD), jnp.int32)],
        compiler_params=pltpu.CompilerParams(
            dimension_semantics=("parallel",),
            vmem_limit_bytes=32 * 1024 * 1024),
    )(n, word_codes)

    if trim_output:
        return tokens128[:B, :MAX_LENGTH]
    # Lane-padded contract: lanes 77..127 are PAD; padded rows already removed.
    return tokens128[:B]


if __name__ == "__main__":
    key = jax.random.PRNGKey(0)

    # Small module-consistent shapes: batch=2 sentences, up to 16 words each.
    B, W = 2, 16
    # Host-side stand-in for text -> per-word codes (string processing is glue).
    word_codes = jax.random.randint(key, (B, W), 1, 2 ** 20, dtype=jnp.int32)
    lengths = jnp.array([5, 12], dtype=jnp.int32)

    tokens = bert_tokenizer_forward(word_codes, lengths, use_kernel=True)
    tokens = jax.block_until_ready(tokens)
    ref = bert_tokenizer_forward(word_codes, lengths, use_kernel=False)

    # Sanity checks mirroring tokenizer semantics.
    assert tokens.shape == (B, MAX_LENGTH)
    assert tokens.dtype == jnp.int32
    assert bool(jnp.all(tokens == ref))
    for b in range(B):
        nb = int(lengths[b])
        assert int(tokens[b, 0]) == CLS_ID
        assert int(tokens[b, nb + 1]) == SEP_ID
        for p in range(1, nb + 1):              # content tokens in-vocab, non-special
            tid = int(tokens[b, p])
            assert UNUSED_LOW <= tid < 30522
        assert all(int(t) == PAD_ID for t in tokens[b, nb + 2:])

    # Exercise the multi-tile, batch-padded kernel path (2 grid steps, row pad).
    key2, key3 = jax.random.split(key)
    B2 = 40
    codes2 = jax.random.randint(key2, (B2, W), 1, 2 ** 20, dtype=jnp.int32)
    lens2 = jax.random.randint(key3, (B2,), 0, W + 4, dtype=jnp.int32)
    out2 = jax.block_until_ready(
        bert_tokenizer_forward(codes2, lens2, use_kernel=True, tile_b_max=24))
    ref2 = bert_tokenizer_forward(codes2, lens2, use_kernel=False)
    assert out2.shape == (B2, MAX_LENGTH)
    assert bool(jnp.all(out2 == ref2))

    print("KERNEL_OK")
</pallas_src>

<mosaic_0001>
module attributes {stable_mosaic.version = 11 : i64} {
  func.func @bert_tokenize_kernel(%arg0: i32, %arg1: memref<8x1xi32, #tpu.memory_space<vmem>>, %arg2: memref<8x16xi32, #tpu.memory_space<vmem>>, %arg3: memref<8x128xi32, #tpu.memory_space<vmem>>, %arg4: memref<8x128xi32, #tpu.memory_space<vmem>>) attributes {dimension_semantics = [#tpu.dimension_semantics<parallel>], iteration_bounds = array<i64: 1>, scalar_prefetch = 0 : i64, scratch_operands = 1 : i64, tpu.core_type = #tpu.core_type<tc>, window_params = [{transform_indices = @transform_0, window_bounds = array<i64: 8, 1>}, {transform_indices = @transform_1, window_bounds = array<i64: 8, 16>}, {transform_indices = @transform_2, window_bounds = array<i64: 8, 128>}]} {
    %c0 = arith.constant 0 : index
    %c0_0 = arith.constant 0 : index
    %0 = vector.load %arg1[%c0, %c0_0] : memref<8x1xi32, #tpu.memory_space<vmem>>, vector<8x1xi32>
    %1 = tpu.iota {dimensions = array<i32: 1>} : vector<8x128xi32>
    %2 = vector.broadcast %0 : vector<8x1xi32> to vector<8x128xi32>
    %3 = arith.subi %1, %2 : vector<8x128xi32>
    %c0_1 = arith.constant 0 : index
    %c0_2 = arith.constant 0 : index
    %4 = vector.load %arg2[%c0_1, %c0_2] : memref<8x16xi32, #tpu.memory_space<vmem>>, vector<8x16xi32>
    %5 = tpu.bitcast %4 : vector<8x16xi32> -> vector<8x16xi32>
    %c1103515245_i32 = arith.constant 1103515245 : i32
    %6 = vector.broadcast %c1103515245_i32 : i32 to vector<8x16xi32>
    %7 = arith.muli %5, %6 : vector<8x16xi32>
    %c12345_i32 = arith.constant 12345 : i32
    %8 = vector.broadcast %c12345_i32 : i32 to vector<8x16xi32>
    %9 = arith.addi %7, %8 : vector<8x16xi32>
    %c16_i32 = arith.constant 16 : i32
    %10 = vector.broadcast %c16_i32 : i32 to vector<8x16xi32>
    %11 = arith.shrui %9, %10 : vector<8x16xi32>
    %12 = arith.xori %9, %11 : vector<8x16xi32>
    %c16383_i32 = arith.constant 16383 : i32
    %13 = vector.broadcast %c16383_i32 : i32 to vector<8x16xi32>
    %14 = arith.andi %12, %13 : vector<8x16xi32>
    %15 = tpu.bitcast %14 : vector<8x16xi32> -> vector<8x16xi32>
    %c999_i32 = arith.constant 999 : i32
    %16 = vector.broadcast %c999_i32 : i32 to vector<8x16xi32>
    %17 = arith.addi %16, %15 : vector<8x16xi32>
    %c0_3 = arith.constant 0 : index
    %c0_4 = arith.constant 0 : index
    %18 = vector.load %arg4[%c0_3, %c0_4] : memref<8x128xi32, #tpu.memory_space<vmem>>, vector<8x16xi32>
    tpu.vector_store %arg4[%c0_3, %c0_4], %17 {strides = array<i32>} : memref<8x128xi32, #tpu.memory_space<vmem>>, vector<8x16xi32>,
    %c0_5 = arith.constant 0 : index
    %c0_6 = arith.constant 0 : index
    %19 = vector.load %arg4[%c0_5, %c0_6] : memref<8x128xi32, #tpu.memory_space<vmem>>, vector<8x128xi32>
    %c1_i32 = arith.constant 1 : i32
    %20 = tpu.dynamic_rotate %19 by %c1_i32 dim 1 : vector<8x128xi32>, i32 -> vector<8x128xi32>
    %c0_i32 = arith.constant 0 : i32
    %21 = vector.broadcast %c0_i32 : i32 to vector<8x128xi32>
    %22 = arith.cmpi sle, %3, %21 : vector<8x128xi32>
    %c0_i32_7 = arith.constant 0 : i32
    %23 = vector.broadcast %c0_i32_7 : i32 to vector<8x128xi32>
    %24 = arith.select %22, %20, %23 : vector<8x128xi1>, vector<8x128xi32>
    %c0_i32_8 = arith.constant 0 : i32
    %25 = vector.broadcast %c0_i32_8 : i32 to vector<8x128xi32>
    %26 = arith.cmpi eq, %1, %25 : vector<8x128xi32>
    %c101_i32 = arith.constant 101 : i32
    %27 = vector.broadcast %c101_i32 : i32 to vector<8x128xi32>
    %28 = arith.select %26, %27, %24 : vector<8x128xi1>, vector<8x128xi32>
    %c1_i32_9 = arith.constant 1 : i32
    %29 = vector.broadcast %c1_i32_9 : i32 to vector<8x128xi32>
    %30 = arith.cmpi eq, %3, %29 : vector<8x128xi32>
    %c102_i32 = arith.constant 102 : i32
    %31 = vector.broadcast %c102_i32 : i32 to vector<8x128xi32>
    %32 = arith.select %30, %31, %28 : vector<8x128xi1>, vector<8x128xi32>
    %c0_10 = arith.constant 0 : index
    %c0_11 = arith.constant 0 : index
    %33 = vector.load %arg3[%c0_10, %c0_11] : memref<8x128xi32, #tpu.memory_space<vmem>>, vector<8x128xi32>
    tpu.vector_store %arg3[%c0_10, %c0_11], %32 {strides = array<i32>} : memref<8x128xi32, #tpu.memory_space<vmem>>, vector<8x128xi32>,
    return
  }
  func.func @transform_0(%arg0: i32) -> (i32, i32) {
    %c0_i32 = arith.constant 0 : i32
    %c0_i32_0 = arith.constant 0 : i32
    return %arg0, %c0_i32 : i32, i32
  }
  func.func @transform_1(%arg0: i32) -> (i32, i32) {
    %c0_i32 = arith.constant 0 : i32
    %c0_i32_0 = arith.constant 0 : i32
    return %arg0, %c0_i32 : i32, i32
  }
  func.func @transform_2(%arg0: i32) -> (i32, i32) {
    %c0_i32 = arith.constant 0 : i32
    %c0_i32_0 = arith.constant 0 : i32
    return %arg0, %c0_i32 : i32, i32
  }
}

</mosaic_0001>

<bundles_post_ra>
// kernel: tpu_custom_call.1
= control target key start
LH: loop header
LB: loop body
LE: loop exit
PB: predicated region body
PF: predicated region fallthrough
CT: control target
= control target key end

     0   :  { %v80_v2 = vmov 0   ;;  %s116_s0 = inlined_call_operand.vmem [shape: s32[8,1], index: 0, kind: input, shape index: {}]   ;;  %s117_s1 = inlined_call_operand.vmem [shape: s32[8,16], index: 1, kind: input, shape index: {}]   ;;  %s118_s2 = inlined_call_operand.hbm [shape: s32[8,128], index: 2, kind: output, shape index: {}]  }
   0x1   :  { %v12_v0 = vld [vmem:[%s116_s0] sm:$0xff]  ;;  %55 = vset.pattern.permute.xlu0 %v80_v2 }
   0x2   :  { %v19_v1 = vld [vmem:[%s117_s1] sm:$0xff] }
   0x3   :  { %v20_v3 = vmul.u32 1103515245, %v19_v1 }
   0x4   :  { %7 = vsyncpa [#allocation4], 0  ;;  %16 = vperm.xlu0 %55, %v12_v0   ;;  %vm26_vm0 = vcmask 130048   ;;  %s81_s13 = smov 1   ;;  %v13_v10 = vlaneseq  ;;  %s82_s0 = smov [#allocation3]  }
   0x5   :  { %v21_v4 = vadd.s32 12345, %v20_v3  ;;  %s44_s1 = sshll.u32 %s82_s0, 4  ;;  %s45_s1 = int_to_ptr.vmem [resolvable:$true] %s44_s1 }
   0x6   :  { %v14_v11 = vand.u32 127, %v13_v10  ;;  %s56_s14 = scalar_lea.vmem %s45_s1, 128  ;;  %p61_p1 = scmp.lt.s32.totalorder %s45_s1, %s45_s1 }
   0x7   :  { %v22_v5 = vshrl.u32 %v21_v4, 16  ;;  %p57_p0 = scmp.ne.s32.totalorder %s45_s1, %s56_s14  ;;  %p62_p2 = scmp.lt.s32.totalorder %s56_s14, %s56_s14 }
   0x8   :  { %vm33_vm2 = vcmp.eq.s32.totalorder %v14_v11, 0 }
   0x9   :  { %v23_v6 = vxor.u32 %v22_v5, %v21_v4  ;;  %p63_p3 = por %p62_p2, %p61_p1 }
   0xb   :  { %v24_v7 = vand.u32 16383, %v23_v6  ;;  %p64_p4 = pnand %p63_p3, %p57_p0 }
   0xd   :  { %v25_v8 = vadd.s32 999, %v24_v7 }
   0xf   :  { %27 = vst.msk [vmem:[#allocation2] sm:$0xff] %vm26_vm0, %v25_v8 }
  0x16   :  { %v28_v9 = vld [vmem:[#allocation2] sm:$0xff] }
  0x17   :  { %29 = vrot.lane.b32.xlu0 %v28_v9, %s81_s13 }
  0x83   :  { %v17_v12 = vpop.permute.xlu0 %16 }
  0x84   :  { %v18_v13 = vsub.s32 %v14_v11, %v17_v12 }
  0x86   :  { %vm31_vm1 = vcmp.le.s32.totalorder %v18_v13, 0  ;;  %vm35_vm3 = vcmp.eq.s32.totalorder %v18_v13, 1 }
  0x89   :  { %v30_v14 = vpop.permute.xlu0 %29 }
  0x8a   :  { %v32_v15 = vsel %vm31_vm1, %v30_v14, 0 }
  0x8b   :  { %v34_v16 = vsel %vm33_vm2, 101, %v32_v15 }
  0x8c   :  { %v36_v17 = vsel %vm35_vm3, 102, %v34_v16 }
  0x8d   :  { %37 = vst [vmem:[#allocation3] sm:$0xff] %v36_v17 }
  0x8e   :  { %67 = shalt.err (!%p64_p4)
}
  0x8f   :  { %s68_s17 = scalar_lea.hbm %s118_s2, 128 }
  0x90   :  { %p69_p5 = scmp.ne.s32.totalorder %s118_s2, %s68_s17  ;;  %p72_p6 = scmp.lt.u32.totalorder %s68_s17, %s118_s2 }
  0x92   :  { %p74_p7 = pnand %p72_p6, %p69_p5 }
  0x94   :  { %77 = shalt.err (!%p74_p7)
}
  0x95   :  { %47 = dma.vmem_to_hbm [thread:$0]  %s45_s1, 128, %s118_s2, [#allocation4]  }
  0x96   :  { %78 = dma.done.wait [#allocation4], 128  }
  0x97   :  { %79 = vsyncadd [#allocation4], 4294967168 }
  0x98   :  { %51 = vsyncpa [#allocation4], 1 }

</bundles_post_ra>
